<compile_context>
chip_gen: v6e
topology: v6e:2x2x1
jax: 0.10.0
libtpu: 0.0.40
codegen_flags: <defaults>
</compile_context>

<pallas_src>
import jax
import jax.numpy as jnp
from jax.experimental import pallas as pl
from jax.experimental.pallas import tpu as pltpu


def _mish_kernel(x_ref, o_ref):
    xf = x_ref[...].astype(jnp.float32)
    # tanh(softplus(x)) with one exp, two-sided to avoid overflow:
    #   t = exp(-|x|)
    #   x >= 0 : (1 + 2t)   / (1 + 2t + 2t^2)
    #   x <  0 : (t^2 + 2t) / (t^2 + 2t + 2)
    pos = xf >= 0.0
    t = jnp.exp(-jnp.abs(xf))                       # EUP
    a = t * t
    num = 2.0 * t + jnp.where(pos, 1.0, a)
    den = num + 2.0 * jnp.where(pos, a, 1.0)        # den >= 1: no div-by-zero
    r = pl.reciprocal(den, approx=True)             # EUP push (free slot)
    if jnp.dtype(o_ref.dtype) == jnp.dtype(jnp.float32):
        r = r * (2.0 - den * r)                     # one Newton step -> ~f32 exact
    o_ref[...] = (xf * num * r).astype(o_ref.dtype)


def _mish_jax(x):
    xf = x.astype(jnp.float32)
    sp = jnp.maximum(xf, 0.0) + jnp.log1p(jnp.exp(-jnp.abs(xf)))
    return (xf * jnp.tanh(sp)).astype(x.dtype)


def _vmem_capacity_bytes():
    try:
        return int(pltpu.get_tpu_info().vmem_capacity_bytes)
    except Exception:
        return 64 * 1024 * 1024   # conservative fallback (v7x per-TC VMEM)


def mish(x, *, tile_rows=8192):
    """Applies Mish elementwise to an array of any shape / float dtype."""
    orig_shape = x.shape
    dtype = x.dtype
    n = x.size
    if n == 0:
        return x

    lanes = 128
    itemsize = jnp.dtype(dtype).itemsize
    # sublane granule: 8 rows for 4-byte dtypes, 16 for 2-byte (packed vregs)
    sub = 8 * max(1, 4 // itemsize)

    flat = x.reshape(-1)                      # free (contiguous)
    n_main = (n // lanes) * lanes             # 128-aligned prefix
    if n_main == 0:
        # fewer than 128 elements: not worth a kernel launch
        return _mish_jax(flat).reshape(orig_shape)

    if n_main == n:
        x_main, tail = flat, None             # zero-copy fast path
    else:
        x_main, tail = flat[:n_main], flat[n_main:]   # tail has < 128 elems

    rows = n_main // lanes
    x2d = x_main.reshape(rows, lanes)         # free (contiguous)

    vmem_cap = _vmem_capacity_bytes()
    max_block_bytes = min(8 * 1024 * 1024, vmem_cap // 8)

    if rows <= sub:
        tr = rows                             # block rows == full array rows
    else:
        # Target a constant ~4 MiB block regardless of dtype (rows scale with
        # 4/itemsize so bf16 does not halve the block bytes).
        tr_target = tile_rows * max(1, 4 // itemsize)
        tr = min(tr_target, (rows // sub) * sub)
        max_block_rows = max(sub, (max_block_bytes // (lanes * itemsize)) // sub * sub)
        tr = min(tr, max_block_rows)
        if rows >= 2 * sub:
            # Keep grid >= 2 blocks so both v7x TensorCores get work on
            # medium-sized inputs (no effect on large inputs).
            half = (((rows + 1) // 2) + sub - 1) // sub * sub
            tr = min(tr, max(sub, half))
        tr = max(sub, (tr // sub) * sub)

    grid = (pl.cdiv(rows, tr),)               # ragged final block handled by masking

    block_bytes = tr * lanes * itemsize
    # Footprint-derived VMEM limit: double-buffered (in + out) blocks + headroom,
    # never the whole physical VMEM of a v7x TensorCore.
    vmem_limit = max(16 * 1024 * 1024,
                     min(4 * block_bytes + 12 * 1024 * 1024,
                         max(24 * 1024 * 1024, vmem_cap // 2)))

    n_elem = rows * lanes
    cost = pl.CostEstimate(
        flops=12 * n_elem,
        transcendentals=2 * n_elem,            # exp + approx reciprocal
        bytes_accessed=2 * n_elem * itemsize,  # stream in + stream out
    )

    out2d = pl.pallas_call(
        _mish_kernel,
        out_shape=jax.ShapeDtypeStruct((rows, lanes), dtype),
        grid_spec=pltpu.PrefetchScalarGridSpec(
            num_scalar_prefetch=0,
            grid=grid,
            in_specs=[pl.BlockSpec((tr, lanes), lambda i: (i, 0))],
            out_specs=pl.BlockSpec((tr, lanes), lambda i: (i, 0)),
        ),
        compiler_params=pltpu.CompilerParams(
            dimension_semantics=("parallel",),   # shards grid across v7x's 2 TCs
            vmem_limit_bytes=vmem_limit,
        ),
        cost_estimate=cost,
    )(x2d)

    out_main = out2d.reshape(-1)
    if tail is None:
        return out_main.reshape(orig_shape)     # free reshape, no extra passes
    # Only when numel % 128 != 0: tiny tail in plain JAX + one concat pass
    # (cheaper than the old full-array pad + kernel-on-padded + slice).
    out_flat = jnp.concatenate([out_main, _mish_jax(tail)])
    return out_flat.reshape(orig_shape)


def mish_ref(x):
    xf = x.astype(jnp.float32)
    sp = jnp.maximum(xf, 0.0) + jnp.log1p(jnp.exp(-jnp.abs(xf)))
    return (xf * jnp.tanh(sp)).astype(x.dtype)


if __name__ == "__main__":
    key = jax.random.PRNGKey(0)
    # NCHW input, same convention as the PyTorch module would see.
    x = jax.random.normal(key, (2, 4, 16, 16), dtype=jnp.float32) * 3.0

    y = mish(x)
    jax.block_until_ready(y)
    y_ref = mish_ref(x)
    assert y.shape == x.shape and y.dtype == x.dtype
    assert jnp.allclose(y, y_ref, atol=1e-4, rtol=1e-3)

    # exercise the ragged path: numel not a multiple of 128
    x2 = jax.random.normal(jax.random.PRNGKey(1), (3, 5, 7, 11), dtype=jnp.float32) * 3.0
    y2 = mish(x2)
    jax.block_until_ready(y2)
    assert y2.shape == x2.shape and y2.dtype == x2.dtype
    assert jnp.allclose(y2, mish_ref(x2), atol=1e-4, rtol=1e-3)

    print("KERNEL_OK")
</pallas_src>

<mosaic_0001>
module attributes {stable_mosaic.version = 11 : i64} {
  func.func @_mish_kernel(%arg0: i32, %arg1: memref<8x128xf32, #tpu.memory_space<vmem>>, %arg2: memref<8x128xf32, #tpu.memory_space<vmem>>) attributes {dimension_semantics = [#tpu.dimension_semantics<parallel>], iteration_bounds = array<i64: 2>, scalar_prefetch = 0 : i64, scratch_operands = 0 : i64, tpu.core_type = #tpu.core_type<tc>, window_params = [{transform_indices = @transform_0, window_bounds = array<i64: 8, 128>}, {transform_indices = @transform_1, window_bounds = array<i64: 8, 128>}]} {
    %c0 = arith.constant 0 : index
    %c0_0 = arith.constant 0 : index
    %0 = vector.load %arg1[%c0, %c0_0] : memref<8x128xf32, #tpu.memory_space<vmem>>, vector<8x128xf32>
    %cst = arith.constant 0.000000e+00 : f32
    %1 = vector.broadcast %cst : f32 to vector<8x128xf32>
    %2 = arith.cmpf oge, %0, %1 : vector<8x128xf32>
    %3 = math.absf %0 : vector<8x128xf32>
    %cst_1 = arith.constant 0.000000e+00 : f32
    %4 = vector.broadcast %cst_1 : f32 to vector<8x128xf32>
    %5 = arith.subf %4, %3 : vector<8x128xf32>
    %6 = math.exp %5 : vector<8x128xf32>
    %7 = arith.mulf %6, %6 : vector<8x128xf32>
    %cst_2 = arith.constant 2.000000e+00 : f32
    %8 = vector.broadcast %cst_2 : f32 to vector<8x128xf32>
    %9 = arith.mulf %8, %6 : vector<8x128xf32>
    %cst_3 = arith.constant 1.000000e+00 : f32
    %10 = vector.broadcast %cst_3 : f32 to vector<8x128xf32>
    %11 = arith.select %2, %10, %7 : vector<8x128xi1>, vector<8x128xf32>
    %12 = arith.addf %9, %11 : vector<8x128xf32>
    %cst_4 = arith.constant 1.000000e+00 : f32
    %13 = vector.broadcast %cst_4 : f32 to vector<8x128xf32>
    %14 = arith.select %2, %7, %13 : vector<8x128xi1>, vector<8x128xf32>
    %cst_5 = arith.constant 2.000000e+00 : f32
    %15 = vector.broadcast %cst_5 : f32 to vector<8x128xf32>
    %16 = arith.mulf %15, %14 : vector<8x128xf32>
    %17 = arith.addf %12, %16 : vector<8x128xf32>
    %18 = tpu.reciprocal %17 {approx = true} : vector<8x128xf32> -> vector<8x128xf32>
    %19 = arith.mulf %17, %18 : vector<8x128xf32>
    %cst_6 = arith.constant 2.000000e+00 : f32
    %20 = vector.broadcast %cst_6 : f32 to vector<8x128xf32>
    %21 = arith.subf %20, %19 : vector<8x128xf32>
    %22 = arith.mulf %18, %21 : vector<8x128xf32>
    %23 = arith.mulf %0, %12 : vector<8x128xf32>
    %24 = arith.mulf %23, %22 : vector<8x128xf32>
    %c0_7 = arith.constant 0 : index
    %c0_8 = arith.constant 0 : index
    %25 = vector.load %arg2[%c0_7, %c0_8] : memref<8x128xf32, #tpu.memory_space<vmem>>, vector<8x128xf32>
    tpu.vector_store %arg2[%c0_7, %c0_8], %24 {strides = array<i32>} : memref<8x128xf32, #tpu.memory_space<vmem>>, vector<8x128xf32>,
    return
  }
  func.func @transform_0(%arg0: i32) -> (i32, i32) {
    %c0_i32 = arith.constant 0 : i32
    %c0_i32_0 = arith.constant 0 : i32
    return %arg0, %c0_i32 : i32, i32
  }
  func.func @transform_1(%arg0: i32) -> (i32, i32) {
    %c0_i32 = arith.constant 0 : i32
    %c0_i32_0 = arith.constant 0 : i32
    return %arg0, %c0_i32 : i32, i32
  }
}

</mosaic_0001>

<bundles_post_ra>
// kernel: tpu_custom_call.1
= control target key start
LH: loop header
LB: loop body
LE: loop exit
PB: predicated region body
PF: predicated region fallthrough
CT: control target
= control target key end

     0   :  { %6 = vsyncpa [#allocation3], 0  ;;  %s545_s0 = inlined_call_operand.hbm [shape: f32[16,128], index: 0, kind: input, shape index: {}]   ;;  %s546_s1 = inlined_call_operand.hbm [shape: f32[16,128], index: 1, kind: output, shape index: {}]  }
   0x1   :  { %8 = vsyncpa [#allocation3 + $0x1], 0 }
   0x2   :  { %9 = vsyncpa [#allocation4], 0 }
   0x3   :  { %11 = vsyncpa [#allocation4 + $0x1], 0  ;;  %s404_s6 = smov 0   ;;  %s406_s7 = smov 0  }
   0x4   :  { %s408_s8 = smov 0   ;;  %s410_s9 = smov 0  }
   0x5 LB: > { %s425_s10 = sadd.s32 4294967295, %s390_s9   ;;  %s236_s11 = sadd.s32 4294967294, %s390_s9   ;;  %s390_s9 = sphi %s410_s9, %s563_s9   ;;  %s386_s8 = sphi %s408_s8, %s562_s8   ;;  %s382_s7 = sphi %s406_s7, %s561_s7   ;;  %s378_s6 = sphi %s404_s6, %s560_s6  }
   0x6   : > { %s429_s12 = sadd.s32 1, %s390_s9   ;;  %s24_s13 = sadd.s32 1, %s386_s8 }
   0x7   : > { %s21_s14 = ssub.s32 %s390_s9, %s429_s12  ;;  %p31_p0 = scmp.ne.s32.totalorder %s386_s8, %s382_s7 }
   0x8   : > { %p22_p1 = scmp.eq.s32.totalorder %s21_s14, 0  ;;  %p32_p2 = scmp.eq.s32.totalorder %s390_s9, 0 }
   0x9   : > { %p37_p3 = scmp.ne.s32.totalorder %s382_s7, %s378_s6  ;;  %p38_p4 = scmp.eq.s32.totalorder %s425_s10, 0 }
   0xa   : > { %s441_s15 = scalar_select %p22_p1, %s386_s8, %s24_s13  }
   0xb   : > { %p443_p5 = por %p32_p2, %p31_p0  ;;  %p447_p6 = por %p38_p4, %p37_p3 }
   0xc   : > { %p61_p7 = scmp.eq.s32.totalorder %s425_s10, 1  ;;  %p67_p8 = scmp.eq.s32.totalorder %s236_s11, 1 }
   0xd   : > { %s550_s17 = scalar_select %p447_p6, 1, 0 }
   0xe   : > { %p260_p10 = scmp.lt.s32.totalorder %s390_s9, 2  ;;  %p454_p11 = por %p61_p7, %p31_p0 }
   0xf   : > { %p458_p12 = por %p67_p8, %p37_p3  ;;  %s87_s20 = sand.u32 1, %s386_s8  }
  0x10   : > { %s551_s18 = scalar_select %p454_p11, 1, 0 }
  0x11   : > { %s552_s19 = scalar_select %p458_p12, 1, 0 }
  0x12   : > { %s240_s21 = sshll.u32 %s390_s9, 7  ;;  %s239_s22 = sshll.u32 %s87_s20, 3 }
  0x13   : > { %s467_s25 = scalar_lea.hbm %s545_s0, %s240_s21  ;;  %s91_s26 = scalar_lea.vmem [#allocation2], %s239_s22 }
  0x14   : > { %s98_s27 = sshll.u32 %s91_s26, 4  ;;  %p471_p13 = pnand %p260_p10, %p443_p5  ;;  %s475_s27 = int_to_ptr.vmem [resolvable:$true] %s98_s27 }
  0x15   : > { %s88_s29 = scalar_lea.sflag [#allocation3], %s87_s20  ;;  %s298_s30 = scalar_lea.hbm %s467_s25, 128 }
  0x16   : > { %p299_p2 = scmp.ne.s32.totalorder %s467_s25, %s298_s30  ;;  %p300_p3 = pneg %p471_p13 }
  0x17   : > { %s303_s4 = scalar_lea.hbm %s545_s0, 256  ;;  %p304_p5 = scmp.lt.s32.totalorder %s467_s25, %s545_s0 }
  0x18   : > { %p301_p4 = pnand %p300_p3, %p299_p2  ;;  %p305_p8 = scmp.lt.s32.totalorder %s303_s4, %s298_s30 }
  0x1a   : > { %p302_p7 = pneg %p301_p4  ;;  %p306_p10 = por %p305_p8, %p304_p5 }
  0x1c   : > { %p307_p9 = pnand %p306_p10, %p302_p7 }
  0x1e   : > { %310 = shalt.err (!%p307_p9)
}
  0x1f   : > { %s311_s13 = scalar_lea.vmem %s475_s27, 128  ;;  %s392_s14 = smov [#allocation2]  }
  0x20   : > { %p312_p0 = scmp.ne.s32.totalorder %s475_s27, %s311_s13  ;;  %s316_s16 = sshll.u32 %s392_s14, 4  ;;  %s317_s16 = int_to_ptr.vmem [resolvable:$false] %s316_s16 }
  0x21   : > { %s318_s20 = scalar_lea.vmem %s317_s16, 256  ;;  %p319_p4 = scmp.lt.s32.totalorder %s475_s27, %s317_s16 }
  0x22   : > { %p314_p1 = pnand %p312_p0, %p300_p3  ;;  %p320_p12 = scmp.lt.s32.totalorder %s318_s20, %s311_s13 }
  0x24   : > { %p315_p2 = pneg %p314_p1  ;;  %p321_p11 = por %p320_p12, %p319_p4 }
  0x26   : > { %p322_p6 = pnand %p321_p11, %p315_p2 }
  0x28   : > { %325 = shalt.err (!%p322_p6)
}
  0x29   : > { %255 = dma.hbm_to_vmem [thread:$0]  (!%p471_p13), %s467_s25, 128, %s475_s27, %s88_s29  }
  0x2a   : > { %p554_p9 = scmp.lt.s32.totalorder %s390_s9, 3  ;;  %p555_p7 = scmp.ge.s32.totalorder %s390_s9, 1 }
  0x2c   : > { %p104_p0 = pnand %p555_p7, %p554_p9 }
  0x2d   : > { %s502_s21 = sand.u32 (!%p104_p0), 1, %s382_s7   ;;  %p556_p6 = scmp.ne.s32.totalorder (!%p104_p0), %s550_s17, 0 }
  0x2e   : > { %107 = sbr.rel (%p104_p0) target bundleno = 115 (0x73), region = 24  ;;  %s242_s22 = sshll.u32 (!%p104_p0), %s502_s21, 3 }
  0x2f   : > { %s110_s23 = scalar_lea.sflag (!%p104_p0), [#allocation3], %s502_s21  ;;  %s113_s24 = scalar_lea.vmem (!%p104_p0), [#allocation2], %s242_s22 }
  0x33   : > { %369 = dma.done.wait (%p556_p6), %s110_s23, 128  }
  0x34   : > { %371 = vsyncadd (%p556_p6), %s110_s23, 4294967168  ;;  %v132_v0 = vld [vmem:[%s113_s24] sm:$0xff]  ;;  %s131_s17 = scalar_lea.vmem [#allocation5], %s242_s22  ;;  %s245_s26 = sshll.u32 %s425_s10, 7 }
  0x35   : > { %v134_v1 = vand.u32 2147483647, %v132_v0  ;;  %vm133_vm0 = vcmp.ge.f32.partialorder %v132_v0, 0.0  ;;  %s166_s25 = sshll.u32 %s131_s17, 4  ;;  %s164_s29 = scalar_lea.hbm %s546_s1, %s245_s26  ;;  %s167_s25 = int_to_ptr.vmem [resolvable:$true] %s166_s25 }
  0x36   : > { %s153_s30 = scalar_lea.sflag [#allocation4], %s502_s21  ;;  %s326_s2 = scalar_lea.vmem %s167_s25, 128 }
  0x37   : > { %v135_v2 = vsub.f32 0.0, %v134_v1  ;;  %p327_p11 = scmp.ne.s32.totalorder %s167_s25, %s326_s2  ;;  %p557_p12 = scmp.ne.s32.totalorder %s551_s18, 0 }
  0x38   : > { %s393_s3 = smov [#allocation5]  }
  0x39   : > { %v136_v3 = vmul.f32 1.442695, %v135_v2  ;;  %p328_p13 = pnand %p327_p11, %p557_p12  ;;  %s330_s4 = sshll.u32 %s393_s3, 4  ;;  %s331_s4 = int_to_ptr.vmem [resolvable:$false] %s330_s4 }
  0x3a   : > { %s332_s5 = scalar_lea.vmem %s331_s4, 256  ;;  %p333_p3 = scmp.lt.s32.totalorder %s167_s25, %s331_s4 }
  0x3b   : > { %294 = vpow2.f32 %v136_v3  ;;  %p329_p1 = pneg %p328_p13  ;;  %p334_p5 = scmp.lt.s32.totalorder %s332_s5, %s326_s2 }
  0x3d   : > { %p335_p8 = por %p334_p5, %p333_p3 }
  0x3f   : > { %p336_p10 = pnand %p335_p8, %p329_p1 }
  0x48   : > { %v295_v4 = vpop.eup %294 }
  0x49   : > { %v138_v5 = vmul.f32 %v295_v4, %v295_v4  ;;  %v139_v6 = vmul.f32 2.0, %v295_v4 }
  0x4b   : > { %v140_v7 = vsel %vm133_vm0, 1.0, %v138_v5  ;;  %v142_v8 = vsel %vm133_vm0, %v138_v5, 1.0 }
  0x4c   : > { %v141_v9 = vadd.f32 %v140_v7, %v139_v6  ;;  %v143_v10 = vmul.f32 2.0, %v142_v8 }
  0x4e   : > { %v144_v11 = vadd.f32 %v143_v10, %v141_v9  ;;  %v149_v15 = vmul.f32 %v141_v9, %v132_v0 }
  0x50   : > { %296 = vrcp.f32 %v144_v11 }
  0x5d   : > { %v297_v12 = vpop.eup %296 }
  0x5e   : > { %v146_v13 = vmul.f32 %v297_v12, %v144_v11 }
  0x60   : > { %v147_v14 = vsub.f32 2.0, %v146_v13 }
  0x62   : > { %v148_v16 = vmul.f32 %v297_v12, %v147_v14 }
  0x64   : > { %v150_v17 = vmul.f32 %v149_v15, %v148_v16 }
  0x66   : > { %151 = vst [vmem:[%s131_s17] sm:$0xff] %v150_v17 }
  0x67   : > { %339 = shalt.err (!%p336_p10)
}
  0x68   : > { %s340_s10 = scalar_lea.hbm %s164_s29, 128  ;;  %s344_s14 = scalar_lea.hbm %s546_s1, 256 }
  0x69   : > { %p341_p2 = scmp.ne.s32.totalorder %s164_s29, %s340_s10  ;;  %p345_p7 = scmp.lt.s32.totalorder %s164_s29, %s546_s1 }
  0x6a   : > { %p346_p0 = scmp.lt.s32.totalorder %s344_s14, %s340_s10 }
  0x6b   : > { %p342_p4 = pnand %p341_p2, %p557_p12 }
  0x6c   : > { %p347_p6 = por %p346_p0, %p345_p7 }
  0x6d   : > { %p343_p9 = pneg %p342_p4 }
  0x6f   : > { %p348_p11 = pnand %p347_p6, %p343_p9 }
  0x71   : > { %351 = shalt.err (!%p348_p11)
}
  0x72   : > { %250 = dma.vmem_to_hbm [thread:$0]  (%p557_p12), %s167_s25, 128, %s164_s29, %s153_s30  }
  0x73 PF: > { %s178_s21 = sand.u32 1, %s378_s6   ;;  %p558_p13 = scmp.ne.s32.totalorder %s552_s19, 0 }
  0x74   : > { %p559_p1 = scmp.ge.s32.totalorder %s390_s9, 2  ;;  %s179_s22 = scalar_lea.sflag [#allocation4], %s178_s21 }
  0x76   : > { %p257_p3 = pnand %p559_p1, %p558_p13 }
  0x78   : > { %p258_p5 = pneg %p257_p3 }
  0x7a   : > { %373 = dma.done.wait (%p258_p5), %s179_s22, 128  }
  0x7b   : > { %375 = vsyncadd (%p258_p5), %s179_s22, 4294967168  ;;  %p14_p8 = scmp.ge.s32.totalorder %s429_s12, 4   ;;  %s560_s6 = smov %s382_s7 }
  0x7c   : > { %s561_s7 = smov %s386_s8  ;;  %s562_s8 = smov %s441_s15 }
  0x7d   : > { %s563_s9 = smov %s429_s12  ;;  %16 = sbr.rel (!%p14_p8) target bundleno = 5 (0x5), region = 69 }
  0x82   :  { %184 = vsyncpa [#allocation3], 1 }
  0x83   :  { %186 = vsyncpa [#allocation3 + $0x1], 1 }
  0x84   :  { %187 = vsyncpa [#allocation4], 1 }
  0x85   :  { %189 = vsyncpa [#allocation4 + $0x1], 1 }

</bundles_post_ra>
